<compile_context>
chip_gen: v7x
topology: tpu7x:2x2x1
jax: 0.10.0
libtpu: 0.0.40
codegen_flags: <defaults>
</compile_context>

<pallas_src>
import jax
import jax.numpy as jnp
import numpy as np
from jax.experimental import pallas as pl
from jax.experimental.pallas import tpu as pltpu

# -------------------------- configuration ------------------------------------
NUM_LAYER = 3          # num_layer (must be >= 2)
EMB = 32               # emb_dim
HID = 2 * EMB          # GIN / VN MLP hidden width
N_NODES = 16           # total nodes across the batch
N_GRAPHS = 2           # batch[-1] + 1
E_PER_GRAPH = 20       # edges per graph
NUM_NODE_TYPES = 8     # SBM node encoder: Embedding(8, emb_dim)
BN_EPS = 1e-5

# lane-dense padded widths (128-lane vregs)
E_PAD = 128            # emb_dim padded
W_PAD = 128            # weight matrices padded to 128x128
A_PAD = 128            # adjacency last dim padded for full-lane DMA

# stacked-weight slab layout (static indices, layers are Python-unrolled)
GW1_BASE = 0                                   # GIN linear1, layers 0..L-1
GW2_BASE = NUM_LAYER                           # GIN linear2, layers 0..L-1
VW1_BASE = 2 * NUM_LAYER                       # VN  linear1, layers 0..L-2
VW2_BASE = 2 * NUM_LAYER + (NUM_LAYER - 1)     # VN  linear2, layers 0..L-2
N_WEIGHTS = 2 * NUM_LAYER + 2 * (NUM_LAYER - 1)


# -------------------------- fused Pallas kernel -------------------------------
def fused_gnn_kernel(x_ref, batch_ref, a_ref, w_ref, sh_ref, eps_ref, out_ref):
  """Entire GNN_node_Virtualnode forward, unrolled over layers in VMEM.

  x_ref     (N, E_PAD)   f32   node embeddings (zero-padded lanes)
  batch_ref (N, 1)       i32   graph id per node
  a_ref     (N, A_PAD)   f32   adjacency, lane-padded; real part is [:, :N]
  w_ref     (10,128,128) bf16  stacked folded weights (see *_BASE layout)
  sh_ref    (L, 4, 128)  f32   shifts: [gin1, gin2, vn1, vn2] per layer
  eps_ref   (L,)         f32   SMEM: GIN train_eps per layer
  """
  batch = batch_ref[...]                       # (N, 1) int32
  h = x_ref[...]                               # (N, E_PAD) f32
  a = a_ref[:, :N_NODES]                       # (N, N) f32, static lane slice
  vn = jnp.zeros((N_GRAPHS, E_PAD), jnp.float32)

  # hoisted per-graph masks: compare emitted once, reused for broadcast & pool
  masks = [batch == g for g in range(N_GRAPHS)]          # each (N, 1) bool

  for layer in range(NUM_LAYER):
    # ---- broadcast virtual node to its graph's nodes (VPU select) ----------
    if N_GRAPHS == 2:
      vn_b = jnp.where(masks[0], vn[0:1, :], vn[1:2, :])
    else:
      vn_b = jnp.zeros_like(h)
      for g in range(N_GRAPHS):
        vn_b = vn_b + jnp.where(masks[g], vn[g:g + 1, :], 0.0)
    hin = h + vn_b

    # ---- GINConv: pre = A @ hin + (1 + eps_l) * hin  (eps scalar from SMEM)
    pre = jnp.dot(a, hin, preferred_element_type=jnp.float32)
    pre = pre + (1.0 + eps_ref[layer]) * hin

    # ---- GIN internal MLP + outer BatchNorm (BN folded into weights) -------
    # bf16 MXU operands, f32 accumulate; all elementwise math stays f32.
    sh = sh_ref[layer]                                          # (4, 128)
    z = jnp.dot(pre.astype(jnp.bfloat16), w_ref[GW1_BASE + layer],
                preferred_element_type=jnp.float32) + sh[0:1, :]
    z = jnp.maximum(z, 0.0)
    z = jnp.dot(z.astype(jnp.bfloat16), w_ref[GW2_BASE + layer],
                preferred_element_type=jnp.float32) + sh[1:2, :]

    if layer < NUM_LAYER - 1:
      z = jnp.maximum(z, 0.0)                  # ReLU only on non-last layers

      # ---- virtual-node update: global_add_pool(hin) + folded MLP ----------
      if N_GRAPHS == 2:
        total = jnp.sum(hin, axis=0, keepdims=True)             # (1, E_PAD)
        row0 = jnp.sum(jnp.where(masks[0], hin, 0.0),
                       axis=0, keepdims=True)                   # (1, E_PAD)
        pooled = jnp.concatenate([row0, total - row0], axis=0) + vn
      else:
        rows = [jnp.sum(jnp.where(masks[g], hin, 0.0), axis=0, keepdims=True)
                for g in range(N_GRAPHS)]
        pooled = jnp.concatenate(rows, axis=0) + vn              # (G, E_PAD)

      u = jnp.dot(pooled.astype(jnp.bfloat16), w_ref[VW1_BASE + layer],
                  preferred_element_type=jnp.float32) + sh[2:3, :]
      u = jnp.maximum(u, 0.0)
      u = jnp.dot(u.astype(jnp.bfloat16), w_ref[VW2_BASE + layer],
                  preferred_element_type=jnp.float32) + sh[3:4, :]
      vn = jnp.maximum(u, 0.0)

    h = z

  out_ref[...] = h                             # lane-dense (N, 128) f32 store


# -------------------------- kernel wrapper ------------------------------------
def _vmem_full(shape):
  nd = len(shape)
  return pl.BlockSpec(shape, lambda i, nd=nd: (0,) * nd)


def _pad_mat(m, rows, cols):
  out = jnp.zeros((rows, cols), jnp.float32)
  return out.at[:m.shape[0], :m.shape[1]].set(m)


def _fold_linear_bn(w, b, s, t):
  # y = (x @ w + b) * s + t  ->  x @ (w * s) + (b * s + t)
  return w * s, b * s + t


def pack_kernel_params(params, A):
  """Fold BN, pad to lane-dense widths, pack into 4 buffers total."""
  w_list = [None] * N_WEIGHTS
  sh_layers, eps_list = [], []

  for layer in range(NUM_LAYER):
    lp = params['layers'][layer]
    w1f, sh1 = _fold_linear_bn(lp['w1'], lp['b1'], lp['s1'], lp['t1'])
    w2f, sh2 = _fold_linear_bn(lp['w2'], lp['b2'], lp['s2'], lp['t2'])
    w_list[GW1_BASE + layer] = _pad_mat(w1f, W_PAD, W_PAD)
    w_list[GW2_BASE + layer] = _pad_mat(w2f, W_PAD, W_PAD)
    rows = [_pad_mat(sh1, 1, 128)[0], _pad_mat(sh2, 1, 128)[0],
            jnp.zeros((128,), jnp.float32), jnp.zeros((128,), jnp.float32)]
    if layer < NUM_LAYER - 1:
      vp = params['vn'][layer]
      vw1f, vsh1 = _fold_linear_bn(vp['w1'], vp['b1'], vp['s1'], vp['t1'])
      vw2f, vsh2 = _fold_linear_bn(vp['w2'], vp['b2'], vp['s2'], vp['t2'])
      w_list[VW1_BASE + layer] = _pad_mat(vw1f, W_PAD, W_PAD)
      w_list[VW2_BASE + layer] = _pad_mat(vw2f, W_PAD, W_PAD)
      rows[2] = _pad_mat(vsh1, 1, 128)[0]
      rows[3] = _pad_mat(vsh2, 1, 128)[0]
    sh_layers.append(jnp.stack(rows))
    eps_list.append(lp['eps'])

  w_slab = jnp.stack(w_list).astype(jnp.bfloat16)         # (10, 128, 128) bf16
  sh_slab = jnp.stack(sh_layers)                          # (L, 4, 128)   f32
  eps_vec = jnp.stack(eps_list).astype(jnp.float32)       # (L,)          f32
  a_pad = jnp.zeros((N_NODES, A_PAD), jnp.float32).at[:, :N_NODES].set(A)
  return a_pad, w_slab, sh_slab, eps_vec


def forward_pallas(x_ids, edge_index, batch, params):
  n = x_ids.shape[0]
  # Densify graph structure (glue): A[dst, src] = #edges src -> dst
  A = jnp.zeros((n, n), jnp.float32).at[edge_index[1], edge_index[0]].add(1.0)
  a_pad, w_slab, sh_slab, eps_vec = pack_kernel_params(params, A)

  h0 = params['node_emb'][x_ids]                              # node_encoder
  x_pad = jnp.zeros((n, E_PAD), jnp.float32).at[:, :EMB].set(h0)
  batch2d = batch.astype(jnp.int32).reshape(n, 1)

  vmem_inputs = (x_pad, batch2d, a_pad, w_slab, sh_slab)
  in_specs = ([_vmem_full(x.shape) for x in vmem_inputs]
              + [pl.BlockSpec(memory_space=pltpu.MemorySpace.SMEM)])  # eps

  out_pad = pl.pallas_call(
      fused_gnn_kernel,
      grid=(1,),
      in_specs=in_specs,
      out_specs=_vmem_full((n, E_PAD)),
      out_shape=jax.ShapeDtypeStruct((n, E_PAD), jnp.float32),
      compiler_params=pltpu.CompilerParams(
          dimension_semantics=("arbitrary",),
          vmem_limit_bytes=32 * 1024 * 1024),
  )(*vmem_inputs, eps_vec)
  return out_pad[:, :EMB]                                     # JK == 'last'


# -------------------------- pure-JAX reference --------------------------------
def forward_reference(x_ids, edge_index, batch, params):
  n = x_ids.shape[0]
  A = jnp.zeros((n, n), jnp.float32).at[edge_index[1], edge_index[0]].add(1.0)
  scat = jax.nn.one_hot(batch, N_GRAPHS, dtype=jnp.float32)   # (N, G)
  h = params['node_emb'][x_ids]
  vn = jnp.zeros((N_GRAPHS, EMB), jnp.float32)
  for layer in range(NUM_LAYER):
    lp = params['layers'][layer]
    hin = h + vn[batch]
    agg = A @ hin
    pre = (1.0 + lp['eps']) * hin + agg
    z = pre @ lp['w1'] + lp['b1']
    z = jnp.maximum(z * lp['s1'] + lp['t1'], 0.0)
    z = z @ lp['w2'] + lp['b2']
    z = z * lp['s2'] + lp['t2']
    if layer < NUM_LAYER - 1:
      z = jnp.maximum(z, 0.0)
      vp = params['vn'][layer]
      tmp = scat.T @ hin + vn
      u = tmp @ vp['w1'] + vp['b1']
      u = jnp.maximum(u * vp['s1'] + vp['t1'], 0.0)
      u = u @ vp['w2'] + vp['b2']
      u = jnp.maximum(u * vp['s2'] + vp['t2'], 0.0)
      vn = u
    h = z
  return h


# -------------------------- parameter construction ---------------------------
def bn_fold(gamma, beta, mean, var):
  scale = gamma / jnp.sqrt(var + BN_EPS)
  shift = beta - mean * scale
  return scale, shift


def make_params(key):
  ks = iter(jax.random.split(key, 256))

  def dense(shape, scale=0.1):
    return (scale * jax.random.normal(next(ks), shape)).astype(jnp.float32)

  def bn_params(dim):
    gamma = 1.0 + 0.1 * jax.random.normal(next(ks), (dim,))
    beta = 0.1 * jax.random.normal(next(ks), (dim,))
    mean = 0.1 * jax.random.normal(next(ks), (dim,))
    var = jax.random.uniform(next(ks), (dim,), minval=0.5, maxval=1.5)
    s, t = bn_fold(gamma, beta, mean, var)
    return (s.astype(jnp.float32).reshape(1, dim),
            t.astype(jnp.float32).reshape(1, dim))

  params = {'node_emb': dense((NUM_NODE_TYPES, EMB), scale=0.5),
            'layers': [], 'vn': []}

  for layer in range(NUM_LAYER):
    s1, t1 = bn_params(HID)         # BatchNorm1d inside GIN MLP
    s2, t2 = bn_params(EMB)         # outer batch_norms[layer]
    params['layers'].append(dict(
        eps=jnp.float32(0.05 * (layer + 1)),          # GINConv train_eps param
        w1=dense((EMB, HID)), b1=dense((1, HID)), s1=s1, t1=t1,
        w2=dense((HID, EMB)), b2=dense((1, EMB)), s2=s2, t2=t2))

  for layer in range(NUM_LAYER - 1):
    s1, t1 = bn_params(HID)
    s2, t2 = bn_params(EMB)
    params['vn'].append(dict(
        w1=dense((EMB, HID)), b1=dense((1, HID)), s1=s1, t1=t1,
        w2=dense((HID, EMB)), b2=dense((1, EMB)), s2=s2, t2=t2))
  return params


# -------------------------- main ----------------------------------------------
if __name__ == "__main__":
  root = jax.random.PRNGKey(0)
  k_param, k_x, k_e0s, k_e0d, k_e1s, k_e1d = jax.random.split(root, 6)

  params = make_params(k_param)

  # batched_data.x : SBM integer node labels in [0, 8)
  x_ids = jax.random.randint(k_x, (N_NODES,), 0, NUM_NODE_TYPES)

  # batched_data.batch : first half graph 0, second half graph 1
  half = N_NODES // 2
  batch = jnp.concatenate([jnp.zeros((half,), jnp.int32),
                           jnp.ones((N_NODES - half,), jnp.int32)])

  # batched_data.edge_index : edges kept within each graph
  src0 = jax.random.randint(k_e0s, (E_PER_GRAPH,), 0, half)
  dst0 = jax.random.randint(k_e0d, (E_PER_GRAPH,), 0, half)
  src1 = jax.random.randint(k_e1s, (E_PER_GRAPH,), half, N_NODES)
  dst1 = jax.random.randint(k_e1d, (E_PER_GRAPH,), half, N_NODES)
  edge_index = jnp.stack([jnp.concatenate([src0, src1]),
                          jnp.concatenate([dst0, dst1])])     # (2, E)

  out = forward_pallas(x_ids, edge_index, batch, params)
  out = jax.block_until_ready(out)

  ref = forward_reference(x_ids, edge_index, batch, params)
  # bf16 MXU operands (f32 accumulate) -> tolerance loosened vs. pure-f32.
  np.testing.assert_allclose(np.asarray(out), np.asarray(ref),
                             rtol=5e-2, atol=5e-2)

  assert out.shape == (N_NODES, EMB) and out.dtype == jnp.float32
  print("KERNEL_OK")
</pallas_src>

<mosaic_0001>
module attributes {stable_mosaic.version = 11 : i64} {
  func.func @fused_gnn_kernel(%arg0: i32, %arg1: memref<16x128xf32, #tpu.memory_space<vmem>>, %arg2: memref<16x1xi32, #tpu.memory_space<vmem>>, %arg3: memref<16x128xf32, #tpu.memory_space<vmem>>, %arg4: memref<10x128x128xbf16, #tpu.memory_space<vmem>>, %arg5: memref<3x4x128xf32, #tpu.memory_space<vmem>>, %arg6: memref<3xf32, #tpu.memory_space<smem>>, %arg7: memref<16x128xf32, #tpu.memory_space<vmem>>) attributes {dimension_semantics = [#tpu.dimension_semantics<arbitrary>], iteration_bounds = array<i64: 1>, scalar_prefetch = 0 : i64, scratch_operands = 0 : i64, tpu.core_type = #tpu.core_type<tc>, window_params = [{pipeline_mode = #tpu.pipeline_mode<synchronous>, transform_indices = @transform_0, window_bounds = array<i64: 16, 128>}, {pipeline_mode = #tpu.pipeline_mode<synchronous>, transform_indices = @transform_1, window_bounds = array<i64: 16, 1>}, {pipeline_mode = #tpu.pipeline_mode<synchronous>, transform_indices = @transform_2, window_bounds = array<i64: 16, 128>}, {pipeline_mode = #tpu.pipeline_mode<synchronous>, transform_indices = @transform_3, window_bounds = array<i64: 10, 128, 128>}, {pipeline_mode = #tpu.pipeline_mode<synchronous>, transform_indices = @transform_4, window_bounds = array<i64: 3, 4, 128>}, {transform_indices = @transform_5, window_bounds = array<i64: 3>}, {pipeline_mode = #tpu.pipeline_mode<synchronous>, transform_indices = @transform_6, window_bounds = array<i64: 16, 128>}]} {
    %c0 = arith.constant 0 : index
    %c0_0 = arith.constant 0 : index
    %0 = vector.load %arg2[%c0, %c0_0] : memref<16x1xi32, #tpu.memory_space<vmem>>, vector<16x1xi32>
    %c0_1 = arith.constant 0 : index
    %c0_2 = arith.constant 0 : index
    %1 = vector.load %arg1[%c0_1, %c0_2] : memref<16x128xf32, #tpu.memory_space<vmem>>, vector<16x128xf32>
    %c0_3 = arith.constant 0 : index
    %c0_4 = arith.constant 0 : index
    %2 = vector.load %arg3[%c0_3, %c0_4] : memref<16x128xf32, #tpu.memory_space<vmem>>, vector<16x16xf32>
    %cst = arith.constant 0.000000e+00 : f32
    %3 = vector.broadcast %cst : f32 to vector<2x128xf32>
    %c0_i32 = arith.constant 0 : i32
    %4 = vector.broadcast %c0_i32 : i32 to vector<16x1xi32>
    %5 = arith.cmpi eq, %0, %4 : vector<16x1xi32>
    %6 = vector.extract_strided_slice %3 {offsets = [0, 0], sizes = [1, 128], strides = [1, 1]} : vector<2x128xf32> to vector<1x128xf32>
    %7 = vector.extract_strided_slice %3 {offsets = [1, 0], sizes = [1, 128], strides = [1, 1]} : vector<2x128xf32> to vector<1x128xf32>
    %8 = vector.shape_cast %5 : vector<16x1xi1> to vector<16x1xi1>
    %9 = vector.broadcast %8 : vector<16x1xi1> to vector<16x128xi1>
    %10 = vector.shape_cast %6 : vector<1x128xf32> to vector<1x128xf32>
    %11 = vector.broadcast %10 : vector<1x128xf32> to vector<16x128xf32>
    %12 = vector.shape_cast %7 : vector<1x128xf32> to vector<1x128xf32>
    %13 = vector.broadcast %12 : vector<1x128xf32> to vector<16x128xf32>
    %14 = arith.select %9, %11, %13 : vector<16x128xi1>, vector<16x128xf32>
    %15 = arith.addf %1, %14 : vector<16x128xf32>
    %cst_5 = arith.constant dense<0.000000e+00> : vector<16x128xf32>
    %16 = tpu.matmul %2, %15, %cst_5 {dimension_numbers = #tpu.dot_dimension_numbers<[1], [0], [0], [1], [0, 0, 1, 1], [], []>} : vector<16x16xf32>, vector<16x128xf32>, vector<16x128xf32> -> vector<16x128xf32>
    %c0_6 = arith.constant 0 : index
    %17 = memref.load %arg6[%c0_6] : memref<3xf32, #tpu.memory_space<smem>>
    %cst_7 = arith.constant 1.000000e+00 : f32
    %18 = arith.addf %cst_7, %17 : f32
    %19 = vector.broadcast %18 : f32 to vector<16x128xf32>
    %20 = arith.mulf %19, %15 : vector<16x128xf32>
    %21 = arith.addf %16, %20 : vector<16x128xf32>
    %c0_8 = arith.constant 0 : index
    %c0_9 = arith.constant 0 : index
    %c0_10 = arith.constant 0 : index
    %22 = vector.load %arg5[%c0_8, %c0_9, %c0_10] : memref<3x4x128xf32, #tpu.memory_space<vmem>>, vector<1x4x128xf32>
    %23 = vector.shape_cast %22 : vector<1x4x128xf32> to vector<4x128xf32>
    %24 = arith.truncf %21 : vector<16x128xf32> to vector<16x128xbf16>
    %c0_11 = arith.constant 0 : index
    %c0_12 = arith.constant 0 : index
    %c0_13 = arith.constant 0 : index
    %25 = vector.load %arg4[%c0_11, %c0_12, %c0_13] : memref<10x128x128xbf16, #tpu.memory_space<vmem>>, vector<1x128x128xbf16>
    %26 = vector.shape_cast %25 : vector<1x128x128xbf16> to vector<128x128xbf16>
    %cst_14 = arith.constant dense<0.000000e+00> : vector<16x128xf32>
    %27 = tpu.matmul %24, %26, %cst_14 {dimension_numbers = #tpu.dot_dimension_numbers<[1], [0], [0], [1], [0, 0, 1, 1], [], []>} : vector<16x128xbf16>, vector<128x128xbf16>, vector<16x128xf32> -> vector<16x128xf32>
    %28 = vector.extract_strided_slice %23 {offsets = [0, 0], sizes = [1, 128], strides = [1, 1]} : vector<4x128xf32> to vector<1x128xf32>
    %29 = vector.broadcast %28 : vector<1x128xf32> to vector<16x128xf32>
    %30 = arith.addf %27, %29 : vector<16x128xf32>
    %cst_15 = arith.constant 0.000000e+00 : f32
    %31 = vector.broadcast %cst_15 : f32 to vector<16x128xf32>
    %32 = arith.maximumf %30, %31 : vector<16x128xf32>
    %33 = arith.truncf %32 : vector<16x128xf32> to vector<16x128xbf16>
    %c3 = arith.constant 3 : index
    %c0_16 = arith.constant 0 : index
    %c0_17 = arith.constant 0 : index
    %34 = vector.load %arg4[%c3, %c0_16, %c0_17] : memref<10x128x128xbf16, #tpu.memory_space<vmem>>, vector<1x128x128xbf16>
    %35 = vector.shape_cast %34 : vector<1x128x128xbf16> to vector<128x128xbf16>
    %cst_18 = arith.constant dense<0.000000e+00> : vector<16x128xf32>
    %36 = tpu.matmul %33, %35, %cst_18 {dimension_numbers = #tpu.dot_dimension_numbers<[1], [0], [0], [1], [0, 0, 1, 1], [], []>} : vector<16x128xbf16>, vector<128x128xbf16>, vector<16x128xf32> -> vector<16x128xf32>
    %37 = vector.extract_strided_slice %23 {offsets = [1, 0], sizes = [1, 128], strides = [1, 1]} : vector<4x128xf32> to vector<1x128xf32>
    %38 = vector.broadcast %37 : vector<1x128xf32> to vector<16x128xf32>
    %39 = arith.addf %36, %38 : vector<16x128xf32>
    %cst_19 = arith.constant 0.000000e+00 : f32
    %40 = vector.broadcast %cst_19 : f32 to vector<16x128xf32>
    %41 = arith.maximumf %39, %40 : vector<16x128xf32>
    %cst_20 = arith.constant dense<0.000000e+00> : vector<128xf32>
    %42 = vector.multi_reduction <add>, %15, %cst_20 [0] : vector<16x128xf32> to vector<128xf32>
    %43 = vector.shape_cast %42 : vector<128xf32> to vector<1x128xf32>
    %cst_21 = arith.constant 0.000000e+00 : f32
    %44 = vector.shape_cast %5 : vector<16x1xi1> to vector<16x1xi1>
    %45 = vector.broadcast %44 : vector<16x1xi1> to vector<16x128xi1>
    %46 = vector.broadcast %cst_21 : f32 to vector<16x128xf32>
    %47 = arith.select %45, %15, %46 : vector<16x128xi1>, vector<16x128xf32>
    %cst_22 = arith.constant dense<0.000000e+00> : vector<128xf32>
    %48 = vector.multi_reduction <add>, %47, %cst_22 [0] : vector<16x128xf32> to vector<128xf32>
    %49 = vector.shape_cast %48 : vector<128xf32> to vector<1x128xf32>
    %50 = arith.subf %43, %49 : vector<1x128xf32>
    %51 = tpu.concatenate %49, %50 in 0 : vector<1x128xf32>, vector<1x128xf32> -> vector<2x128xf32>
    %52 = arith.addf %51, %3 : vector<2x128xf32>
    %53 = arith.truncf %52 : vector<2x128xf32> to vector<2x128xbf16>
    %c6 = arith.constant 6 : index
    %c0_23 = arith.constant 0 : index
    %c0_24 = arith.constant 0 : index
    %54 = vector.load %arg4[%c6, %c0_23, %c0_24] : memref<10x128x128xbf16, #tpu.memory_space<vmem>>, vector<1x128x128xbf16>
    %55 = vector.shape_cast %54 : vector<1x128x128xbf16> to vector<128x128xbf16>
    %cst_25 = arith.constant dense<0.000000e+00> : vector<2x128xf32>
    %56 = tpu.matmul %53, %55, %cst_25 {dimension_numbers = #tpu.dot_dimension_numbers<[1], [0], [0], [1], [0, 0, 1, 1], [], []>} : vector<2x128xbf16>, vector<128x128xbf16>, vector<2x128xf32> -> vector<2x128xf32>
    %57 = vector.extract_strided_slice %23 {offsets = [2, 0], sizes = [1, 128], strides = [1, 1]} : vector<4x128xf32> to vector<1x128xf32>
    %58 = vector.broadcast %57 : vector<1x128xf32> to vector<2x128xf32>
    %59 = arith.addf %56, %58 : vector<2x128xf32>
    %cst_26 = arith.constant 0.000000e+00 : f32
    %60 = vector.broadcast %cst_26 : f32 to vector<2x128xf32>
    %61 = arith.maximumf %59, %60 : vector<2x128xf32>
    %62 = arith.truncf %61 : vector<2x128xf32> to vector<2x128xbf16>
    %c8 = arith.constant 8 : index
    %c0_27 = arith.constant 0 : index
    %c0_28 = arith.constant 0 : index
    %63 = vector.load %arg4[%c8, %c0_27, %c0_28] : memref<10x128x128xbf16, #tpu.memory_space<vmem>>, vector<1x128x128xbf16>
    %64 = vector.shape_cast %63 : vector<1x128x128xbf16> to vector<128x128xbf16>
    %cst_29 = arith.constant dense<0.000000e+00> : vector<2x128xf32>
    %65 = tpu.matmul %62, %64, %cst_29 {dimension_numbers = #tpu.dot_dimension_numbers<[1], [0], [0], [1], [0, 0, 1, 1], [], []>} : vector<2x128xbf16>, vector<128x128xbf16>, vector<2x128xf32> -> vector<2x128xf32>
    %66 = vector.extract_strided_slice %23 {offsets = [3, 0], sizes = [1, 128], strides = [1, 1]} : vector<4x128xf32> to vector<1x128xf32>
    %67 = vector.broadcast %66 : vector<1x128xf32> to vector<2x128xf32>
    %68 = arith.addf %65, %67 : vector<2x128xf32>
    %cst_30 = arith.constant 0.000000e+00 : f32
    %69 = vector.broadcast %cst_30 : f32 to vector<2x128xf32>
    %70 = arith.maximumf %68, %69 : vector<2x128xf32>
    %71 = vector.extract_strided_slice %70 {offsets = [0, 0], sizes = [1, 128], strides = [1, 1]} : vector<2x128xf32> to vector<1x128xf32>
    %72 = vector.extract_strided_slice %70 {offsets = [1, 0], sizes = [1, 128], strides = [1, 1]} : vector<2x128xf32> to vector<1x128xf32>
    %73 = vector.shape_cast %5 : vector<16x1xi1> to vector<16x1xi1>
    %74 = vector.broadcast %73 : vector<16x1xi1> to vector<16x128xi1>
    %75 = vector.shape_cast %71 : vector<1x128xf32> to vector<1x128xf32>
    %76 = vector.broadcast %75 : vector<1x128xf32> to vector<16x128xf32>
    %77 = vector.shape_cast %72 : vector<1x128xf32> to vector<1x128xf32>
    %78 = vector.broadcast %77 : vector<1x128xf32> to vector<16x128xf32>
    %79 = arith.select %74, %76, %78 : vector<16x128xi1>, vector<16x128xf32>
    %80 = arith.addf %41, %79 : vector<16x128xf32>
    %cst_31 = arith.constant dense<0.000000e+00> : vector<16x128xf32>
    %81 = tpu.matmul %2, %80, %cst_31 {dimension_numbers = #tpu.dot_dimension_numbers<[1], [0], [0], [1], [0, 0, 1, 1], [], []>} : vector<16x16xf32>, vector<16x128xf32>, vector<16x128xf32> -> vector<16x128xf32>
    %c1 = arith.constant 1 : index
    %82 = memref.load %arg6[%c1] : memref<3xf32, #tpu.memory_space<smem>>
    %cst_32 = arith.constant 1.000000e+00 : f32
    %83 = arith.addf %cst_32, %82 : f32
    %84 = vector.broadcast %83 : f32 to vector<16x128xf32>
    %85 = arith.mulf %84, %80 : vector<16x128xf32>
    %86 = arith.addf %81, %85 : vector<16x128xf32>
    %c1_33 = arith.constant 1 : index
    %c0_34 = arith.constant 0 : index
    %c0_35 = arith.constant 0 : index
    %87 = vector.load %arg5[%c1_33, %c0_34, %c0_35] : memref<3x4x128xf32, #tpu.memory_space<vmem>>, vector<1x4x128xf32>
    %88 = vector.shape_cast %87 : vector<1x4x128xf32> to vector<4x128xf32>
    %89 = arith.truncf %86 : vector<16x128xf32> to vector<16x128xbf16>
    %c1_36 = arith.constant 1 : index
    %c0_37 = arith.constant 0 : index
    %c0_38 = arith.constant 0 : index
    %90 = vector.load %arg4[%c1_36, %c0_37, %c0_38] : memref<10x128x128xbf16, #tpu.memory_space<vmem>>, vector<1x128x128xbf16>
    %91 = vector.shape_cast %90 : vector<1x128x128xbf16> to vector<128x128xbf16>
    %cst_39 = arith.constant dense<0.000000e+00> : vector<16x128xf32>
    %92 = tpu.matmul %89, %91, %cst_39 {dimension_numbers = #tpu.dot_dimension_numbers<[1], [0], [0], [1], [0, 0, 1, 1], [], []>} : vector<16x128xbf16>, vector<128x128xbf16>, vector<16x128xf32> -> vector<16x128xf32>
    %93 = vector.extract_strided_slice %88 {offsets = [0, 0], sizes = [1, 128], strides = [1, 1]} : vector<4x128xf32> to vector<1x128xf32>
    %94 = vector.broadcast %93 : vector<1x128xf32> to vector<16x128xf32>
    %95 = arith.addf %92, %94 : vector<16x128xf32>
    %cst_40 = arith.constant 0.000000e+00 : f32
    %96 = vector.broadcast %cst_40 : f32 to vector<16x128xf32>
    %97 = arith.maximumf %95, %96 : vector<16x128xf32>
    %98 = arith.truncf %97 : vector<16x128xf32> to vector<16x128xbf16>
    %c4 = arith.constant 4 : index
    %c0_41 = arith.constant 0 : index
    %c0_42 = arith.constant 0 : index
    %99 = vector.load %arg4[%c4, %c0_41, %c0_42] : memref<10x128x128xbf16, #tpu.memory_space<vmem>>, vector<1x128x128xbf16>
    %100 = vector.shape_cast %99 : vector<1x128x128xbf16> to vector<128x128xbf16>
    %cst_43 = arith.constant dense<0.000000e+00> : vector<16x128xf32>
    %101 = tpu.matmul %98, %100, %cst_43 {dimension_numbers = #tpu.dot_dimension_numbers<[1], [0], [0], [1], [0, 0, 1, 1], [], []>} : vector<16x128xbf16>, vector<128x128xbf16>, vector<16x128xf32> -> vector<16x128xf32>
    %102 = vector.extract_strided_slice %88 {offsets = [1, 0], sizes = [1, 128], strides = [1, 1]} : vector<4x128xf32> to vector<1x128xf32>
    %103 = vector.broadcast %102 : vector<1x128xf32> to vector<16x128xf32>
    %104 = arith.addf %101, %103 : vector<16x128xf32>
    %cst_44 = arith.constant 0.000000e+00 : f32
    %105 = vector.broadcast %cst_44 : f32 to vector<16x128xf32>
    %106 = arith.maximumf %104, %105 : vector<16x128xf32>
    %cst_45 = arith.constant dense<0.000000e+00> : vector<128xf32>
    %107 = vector.multi_reduction <add>, %80, %cst_45 [0] : vector<16x128xf32> to vector<128xf32>
    %108 = vector.shape_cast %107 : vector<128xf32> to vector<1x128xf32>
    %cst_46 = arith.constant 0.000000e+00 : f32
    %109 = vector.shape_cast %5 : vector<16x1xi1> to vector<16x1xi1>
    %110 = vector.broadcast %109 : vector<16x1xi1> to vector<16x128xi1>
    %111 = vector.broadcast %cst_46 : f32 to vector<16x128xf32>
    %112 = arith.select %110, %80, %111 : vector<16x128xi1>, vector<16x128xf32>
    %cst_47 = arith.constant dense<0.000000e+00> : vector<128xf32>
    %113 = vector.multi_reduction <add>, %112, %cst_47 [0] : vector<16x128xf32> to vector<128xf32>
    %114 = vector.shape_cast %113 : vector<128xf32> to vector<1x128xf32>
    %115 = arith.subf %108, %114 : vector<1x128xf32>
    %116 = tpu.concatenate %114, %115 in 0 : vector<1x128xf32>, vector<1x128xf32> -> vector<2x128xf32>
    %117 = arith.addf %116, %70 : vector<2x128xf32>
    %118 = arith.truncf %117 : vector<2x128xf32> to vector<2x128xbf16>
    %c7 = arith.constant 7 : index
    %c0_48 = arith.constant 0 : index
    %c0_49 = arith.constant 0 : index
    %119 = vector.load %arg4[%c7, %c0_48, %c0_49] : memref<10x128x128xbf16, #tpu.memory_space<vmem>>, vector<1x128x128xbf16>
    %120 = vector.shape_cast %119 : vector<1x128x128xbf16> to vector<128x128xbf16>
    %cst_50 = arith.constant dense<0.000000e+00> : vector<2x128xf32>
    %121 = tpu.matmul %118, %120, %cst_50 {dimension_numbers = #tpu.dot_dimension_numbers<[1], [0], [0], [1], [0, 0, 1, 1], [], []>} : vector<2x128xbf16>, vector<128x128xbf16>, vector<2x128xf32> -> vector<2x128xf32>
    %122 = vector.extract_strided_slice %88 {offsets = [2, 0], sizes = [1, 128], strides = [1, 1]} : vector<4x128xf32> to vector<1x128xf32>
    %123 = vector.broadcast %122 : vector<1x128xf32> to vector<2x128xf32>
    %124 = arith.addf %121, %123 : vector<2x128xf32>
    %cst_51 = arith.constant 0.000000e+00 : f32
    %125 = vector.broadcast %cst_51 : f32 to vector<2x128xf32>
    %126 = arith.maximumf %124, %125 : vector<2x128xf32>
    %127 = arith.truncf %126 : vector<2x128xf32> to vector<2x128xbf16>
    %c9 = arith.constant 9 : index
    %c0_52 = arith.constant 0 : index
    %c0_53 = arith.constant 0 : index
    %128 = vector.load %arg4[%c9, %c0_52, %c0_53] : memref<10x128x128xbf16, #tpu.memory_space<vmem>>, vector<1x128x128xbf16>
    %129 = vector.shape_cast %128 : vector<1x128x128xbf16> to vector<128x128xbf16>
    %cst_54 = arith.constant dense<0.000000e+00> : vector<2x128xf32>
    %130 = tpu.matmul %127, %129, %cst_54 {dimension_numbers = #tpu.dot_dimension_numbers<[1], [0], [0], [1], [0, 0, 1, 1], [], []>} : vector<2x128xbf16>, vector<128x128xbf16>, vector<2x128xf32> -> vector<2x128xf32>
    %131 = vector.extract_strided_slice %88 {offsets = [3, 0], sizes = [1, 128], strides = [1, 1]} : vector<4x128xf32> to vector<1x128xf32>
    %132 = vector.broadcast %131 : vector<1x128xf32> to vector<2x128xf32>
    %133 = arith.addf %130, %132 : vector<2x128xf32>
    %cst_55 = arith.constant 0.000000e+00 : f32
    %134 = vector.broadcast %cst_55 : f32 to vector<2x128xf32>
    %135 = arith.maximumf %133, %134 : vector<2x128xf32>
    %136 = vector.extract_strided_slice %135 {offsets = [0, 0], sizes = [1, 128], strides = [1, 1]} : vector<2x128xf32> to vector<1x128xf32>
    %137 = vector.extract_strided_slice %135 {offsets = [1, 0], sizes = [1, 128], strides = [1, 1]} : vector<2x128xf32> to vector<1x128xf32>
    %138 = vector.shape_cast %5 : vector<16x1xi1> to vector<16x1xi1>
    %139 = vector.broadcast %138 : vector<16x1xi1> to vector<16x128xi1>
    %140 = vector.shape_cast %136 : vector<1x128xf32> to vector<1x128xf32>
    %141 = vector.broadcast %140 : vector<1x128xf32> to vector<16x128xf32>
    %142 = vector.shape_cast %137 : vector<1x128xf32> to vector<1x128xf32>
    %143 = vector.broadcast %142 : vector<1x128xf32> to vector<16x128xf32>
    %144 = arith.select %139, %141, %143 : vector<16x128xi1>, vector<16x128xf32>
    %145 = arith.addf %106, %144 : vector<16x128xf32>
    %cst_56 = arith.constant dense<0.000000e+00> : vector<16x128xf32>
    %146 = tpu.matmul %2, %145, %cst_56 {dimension_numbers = #tpu.dot_dimension_numbers<[1], [0], [0], [1], [0, 0, 1, 1], [], []>} : vector<16x16xf32>, vector<16x128xf32>, vector<16x128xf32> -> vector<16x128xf32>
    %c2 = arith.constant 2 : index
    %147 = memref.load %arg6[%c2] : memref<3xf32, #tpu.memory_space<smem>>
    %cst_57 = arith.constant 1.000000e+00 : f32
    %148 = arith.addf %cst_57, %147 : f32
    %149 = vector.broadcast %148 : f32 to vector<16x128xf32>
    %150 = arith.mulf %149, %145 : vector<16x128xf32>
    %151 = arith.addf %146, %150 : vector<16x128xf32>
    %c2_58 = arith.constant 2 : index
    %c0_59 = arith.constant 0 : index
    %c0_60 = arith.constant 0 : index
    %152 = vector.load %arg5[%c2_58, %c0_59, %c0_60] : memref<3x4x128xf32, #tpu.memory_space<vmem>>, vector<1x4x128xf32>
    %153 = vector.shape_cast %152 : vector<1x4x128xf32> to vector<4x128xf32>
    %154 = arith.truncf %151 : vector<16x128xf32> to vector<16x128xbf16>
    %c2_61 = arith.constant 2 : index
    %c0_62 = arith.constant 0 : index
    %c0_63 = arith.constant 0 : index
    %155 = vector.load %arg4[%c2_61, %c0_62, %c0_63] : memref<10x128x128xbf16, #tpu.memory_space<vmem>>, vector<1x128x128xbf16>
    %156 = vector.shape_cast %155 : vector<1x128x128xbf16> to vector<128x128xbf16>
    %cst_64 = arith.constant dense<0.000000e+00> : vector<16x128xf32>
    %157 = tpu.matmul %154, %156, %cst_64 {dimension_numbers = #tpu.dot_dimension_numbers<[1], [0], [0], [1], [0, 0, 1, 1], [], []>} : vector<16x128xbf16>, vector<128x128xbf16>, vector<16x128xf32> -> vector<16x128xf32>
    %158 = vector.extract_strided_slice %153 {offsets = [0, 0], sizes = [1, 128], strides = [1, 1]} : vector<4x128xf32> to vector<1x128xf32>
    %159 = vector.broadcast %158 : vector<1x128xf32> to vector<16x128xf32>
    %160 = arith.addf %157, %159 : vector<16x128xf32>
    %cst_65 = arith.constant 0.000000e+00 : f32
    %161 = vector.broadcast %cst_65 : f32 to vector<16x128xf32>
    %162 = arith.maximumf %160, %161 : vector<16x128xf32>
    %163 = arith.truncf %162 : vector<16x128xf32> to vector<16x128xbf16>
    %c5 = arith.constant 5 : index
    %c0_66 = arith.constant 0 : index
    %c0_67 = arith.constant 0 : index
    %164 = vector.load %arg4[%c5, %c0_66, %c0_67] : memref<10x128x128xbf16, #tpu.memory_space<vmem>>, vector<1x128x128xbf16>
    %165 = vector.shape_cast %164 : vector<1x128x128xbf16> to vector<128x128xbf16>
    %cst_68 = arith.constant dense<0.000000e+00> : vector<16x128xf32>
    %166 = tpu.matmul %163, %165, %cst_68 {dimension_numbers = #tpu.dot_dimension_numbers<[1], [0], [0], [1], [0, 0, 1, 1], [], []>} : vector<16x128xbf16>, vector<128x128xbf16>, vector<16x128xf32> -> vector<16x128xf32>
    %167 = vector.extract_strided_slice %153 {offsets = [1, 0], sizes = [1, 128], strides = [1, 1]} : vector<4x128xf32> to vector<1x128xf32>
    %168 = vector.broadcast %167 : vector<1x128xf32> to vector<16x128xf32>
    %169 = arith.addf %166, %168 : vector<16x128xf32>
    %c0_69 = arith.constant 0 : index
    %c0_70 = arith.constant 0 : index
    %170 = vector.load %arg7[%c0_69, %c0_70] : memref<16x128xf32, #tpu.memory_space<vmem>>, vector<16x128xf32>
    tpu.vector_store %arg7[%c0_69, %c0_70], %169 {strides = array<i32>} : memref<16x128xf32, #tpu.memory_space<vmem>>, vector<16x128xf32>,
    return
  }
  func.func @transform_0(%arg0: i32) -> (i32, i32) {
    %c0_i32 = arith.constant 0 : i32
    %c0_i32_0 = arith.constant 0 : i32
    %c0_i32_1 = arith.constant 0 : i32
    return %c0_i32, %c0_i32_0 : i32, i32
  }
  func.func @transform_1(%arg0: i32) -> (i32, i32) {
    %c0_i32 = arith.constant 0 : i32
    %c0_i32_0 = arith.constant 0 : i32
    %c0_i32_1 = arith.constant 0 : i32
    return %c0_i32, %c0_i32_0 : i32, i32
  }
  func.func @transform_2(%arg0: i32) -> (i32, i32) {
    %c0_i32 = arith.constant 0 : i32
    %c0_i32_0 = arith.constant 0 : i32
    %c0_i32_1 = arith.constant 0 : i32
    return %c0_i32, %c0_i32_0 : i32, i32
  }
  func.func @transform_3(%arg0: i32) -> (i32, i32, i32) {
    %c0_i32 = arith.constant 0 : i32
    %c0_i32_0 = arith.constant 0 : i32
    %c0_i32_1 = arith.constant 0 : i32
    %c0_i32_2 = arith.constant 0 : i32
    return %c0_i32, %c0_i32_0, %c0_i32_1 : i32, i32, i32
  }
  func.func @transform_4(%arg0: i32) -> (i32, i32, i32) {
    %c0_i32 = arith.constant 0 : i32
    %c0_i32_0 = arith.constant 0 : i32
    %c0_i32_1 = arith.constant 0 : i32
    %c0_i32_2 = arith.constant 0 : i32
    return %c0_i32, %c0_i32_0, %c0_i32_1 : i32, i32, i32
  }
  func.func @transform_5(%arg0: i32) -> i32 {
    %c0_i32 = arith.constant 0 : i32
    %c0_i32_0 = arith.constant 0 : i32
    return %c0_i32 : i32
  }
  func.func @transform_6(%arg0: i32) -> (i32, i32) {
    %c0_i32 = arith.constant 0 : i32
    %c0_i32_0 = arith.constant 0 : i32
    %c0_i32_1 = arith.constant 0 : i32
    return %c0_i32, %c0_i32_0 : i32, i32
  }
}

</mosaic_0001>

<bundles_post_ra>
// kernel: tpu_custom_call.1
= control target key start
LH: loop header
LB: loop body
LE: loop exit
PB: predicated region body
PF: predicated region fallthrough
CT: control target
= control target key end

     0   :  { %11 = vsyncpa [#allocation3], 0  ;;  %s2448_s0 = inlined_call_operand.vmem [shape: f32[16,128], index: 0, kind: input, shape index: {}]   ;;  %s2449_s1 = inlined_call_operand.vmem [shape: s32[16,1], index: 1, kind: input, shape index: {}]   ;;  %s2450_s2 = inlined_call_operand.hbm [shape: f32[16,128], index: 2, kind: input, shape index: {}]   ;;  %s2451_s3 = inlined_call_operand.hbm [shape: bf16[10,128,128], index: 3, kind: input, shape index: {}]   ;;  %s2452_s4 = inlined_call_operand.vmem [shape: f32[3,4,128], index: 4, kind: input, shape index: {}]   ;;  %s2453_s5 = inlined_call_operand.vmem [shape: f32[3], index: 5, kind: input, shape index: {}]   ;;  %s2454_s6 = inlined_call_operand.hbm [shape: f32[16,128], index: 6, kind: output, shape index: {}]  }
   0x1   :  { %12 = vsyncpa [#allocation7], 0 }
   0x2   :  { %13 = vsyncpa [#allocation5], 0 }
   0x3   :  { %14 = vsyncpa [#allocation4], 0  ;;  %s2145_s21 = smov [#allocation2]   ;;  %s2059_s25 = scalar_lea.hbm %s2450_s2, 256 }
   0x4   :  { %s24_s22 = sshll.u32 %s2145_s21, 4  ;;  %p2060_p0 = scmp.ne.s32.totalorder %s2450_s2, %s2059_s25  ;;  %s25_s22 = int_to_ptr.vmem [resolvable:$true] %s24_s22 }
   0x5   :  { %p2063_p1 = scmp.lt.u32.totalorder %s2059_s25, %s2450_s2 }
   0x7   :  { %p2065_p2 = pnand %p2063_p1, %p2060_p0 }
   0x9   :  { %2068 = shalt.err (!%p2065_p2)
}
   0xa   :  { %s2069_s30 = scalar_lea.vmem %s25_s22, 256  ;;  %p2074_p4 = scmp.lt.s32.totalorder %s25_s22, %s25_s22 }
   0xb   :  { %p2070_p3 = scmp.ne.s32.totalorder %s25_s22, %s2069_s30  ;;  %p2075_p5 = scmp.lt.s32.totalorder %s2069_s30, %s2069_s30 }
   0xd   :  { %p2076_p6 = por %p2075_p5, %p2074_p4 }
   0xf   :  { %p2077_p7 = pnand %p2076_p6, %p2070_p3 }
  0x11   :  { %2080 = shalt.err (!%p2077_p7)
}
  0x12   :  { %s2146_s7 = smov 128   ;;  %s2147_s8 = smov 8  }
  0x13   :  { %30 = dma.hbm_to_vmem [thread:$0]  %s2450_s2, 256, %s25_s22, [#allocation3], %s2146_s7, %s2146_s7, %s2147_s8  }
  0x14   :  { %s2148_s11 = smov [#allocation6]   ;;  %s2081_s15 = scalar_lea.hbm %s2451_s3, 10240 }
  0x15   :  { %s36_s12 = sshll.u32 %s2148_s11, 4  ;;  %p2082_p8 = scmp.ne.s32.totalorder %s2451_s3, %s2081_s15  ;;  %s37_s12 = int_to_ptr.vmem [resolvable:$true] %s36_s12 }
  0x16   :  { %p2085_p9 = scmp.lt.u32.totalorder %s2081_s15, %s2451_s3 }
  0x18   :  { %p2087_p10 = pnand %p2085_p9, %p2082_p8 }
  0x1a   :  { %2090 = shalt.err (!%p2087_p10)
}
  0x1b   :  { %s2091_s20 = scalar_lea.vmem %s37_s12, 10240  ;;  %p2096_p12 = scmp.lt.s32.totalorder %s37_s12, %s37_s12 }
  0x1c   :  { %p2092_p11 = scmp.ne.s32.totalorder %s37_s12, %s2091_s20  ;;  %p2097_p13 = scmp.lt.s32.totalorder %s2091_s20, %s2091_s20 }
  0x1e   :  { %p2098_p0 = por %p2097_p13, %p2096_p12 }
  0x20   :  { %p2099_p1 = pnand %p2098_p0, %p2092_p11 }
  0x22   :  { %2102 = shalt.err (!%p2099_p1)
}
  0x23   :  { %s2149_s2 = smov 64   ;;  %s2150_s21 = smov 4  }
  0x24   :  { %42 = dma.hbm_to_vmem [thread:$0]  %s2451_s3, 10240, %s37_s12, [#allocation7], %s2149_s2, %s2149_s2, %s2150_s21  }
  0x25   :  { %s51_s26 = sshll.u32 %s2453_s5, 4  ;;  %s52_s26 = int_to_ptr.vmem [resolvable:$true] %s51_s26 }
  0x26   :  { %s2103_s27 = scalar_lea.vmem %s52_s26, 16  ;;  %p2108_p3 = scmp.lt.s32.totalorder %s52_s26, %s52_s26 }
  0x27   :  { %p2104_p2 = scmp.ne.s32.totalorder %s52_s26, %s2103_s27  ;;  %p2109_p4 = scmp.lt.s32.totalorder %s2103_s27, %s2103_s27 }
  0x29   :  { %p2110_p5 = por %p2109_p4, %p2108_p3 }
  0x2b   :  { %p2111_p6 = pnand %p2110_p5, %p2104_p2 }
  0x2d   :  { %2114 = shalt.err (!%p2111_p6)
}
  0x2e   :  { %s2151_s28 = smov [#allocation8]  }
  0x2f   :  { %54 = dma.vmem_to_smem %s52_s26, 16, %s2151_s28, [#allocation5]  }
  0x30   :  { %2137 = dma.done.wait [#allocation3], 256  }
  0x31   :  { %2138 = vsyncadd [#allocation3], 4294967040 }
  0x32   :  { %2139 = dma.done.wait [#allocation7], 10240  }
  0x33   :  { %2140 = vsyncadd [#allocation7], 4294957056 }
  0x34   :  { %2141 = dma.done.wait [#allocation5], 16  }
  0x35   :  { %2142 = vsyncadd [#allocation5], 4294967280 }
  0x36   :  { %64 = sfence }
  0x37   :  { %v2224_v0 = vld [vmem:[%s2448_s0] sm:$0xff]  ;;  %v2229_v1 = vld [vmem:[%s2448_s0 + $0x8] sm:$0xff]  ;;  %vm81_vm0 = vcmask 130048   ;;  %v2152_v4 = vmov 0   ;;  %v2153_v7 = vmov 0.0   ;;  %v1978_v9 = vld [vmem:[#allocation6] sm:$0xff]  }
  0x38   :  { %v2231_v2 = vld [vmem:[#allocation2] sm:$0xff]  ;;  %v1954_v3 = vpack.c.bf16 %v2229_v1, %v2224_v0  ;;  %1977 = vset.pattern.permute.xlu0 %v2152_v4  ;;  %v67_v6 = vld [vmem:[%s2449_s1 + $0x8] sm:$0xff]  ;;  %1740 = vmatprep.subr.bf16.mxu1 %v2153_v7  ;;  %v1979_v12 = vld [vmem:[#allocation6 + $0x8] sm:$0xff]   ;;  %vm2154_vm3 = vmmov 0   ;;  %s76_s0 = sld [smem:[#allocation8]]  ;;  %v389_v33 = vadd.f32 %v2229_v1, %v2224_v0  ;;  %vm416_vm6 = vcmask 1040384  }
  0x39   :  { %1737 = vmatprep.mubr.msk.f32.mxu0 %vm81_vm0, %v2231_v2  ;;  %v66_v5 = vld [vmem:[%s2449_s1] sm:$0xff]  ;;  %vm73_vm2 = vcmp.eq.s32.totalorder %v67_v6, 0  ;;  %v2244_v10 = vld [vmem:[#allocation2 + $0x8] sm:$0xff]  ;;  %1741 = vmatpush3.bf16.msra.mxu1 %v1978_v9  ;;  %v1982_v15 = vld [vmem:[#allocation6 + $0x20] sm:$0xff]   ;;  %s1575_s15 = sld [smem:[#allocation8 + $0x1]]  ;;  %s1611_s19 = sld [smem:[#allocation8 + $0x2]] }
  0x3a   :  { %vm72_vm1 = vcmp.eq.s32.totalorder %v66_v5, 0  ;;  %1955 = vmatprep.subr.bf16.mxu0 %v1954_v3  ;;  %v397_v11 = vsel %vm73_vm2, 1, %v2152_v4  ;;  %1742 = vmatprep.subr.bf16.mxu1 %v2153_v7  ;;  %v1980_v13 = vld [vmem:[#allocation6 + $0x10] sm:$0xff]   ;;  %v1981_v14 = vld [vmem:[#allocation6 + $0x18] sm:$0xff]   ;;  %v1983_v16 = vld [vmem:[#allocation6 + $0x28] sm:$0xff]   ;;  %v390_v40 = vrot.slane %v389_v33, 4 }
  0x3b   :  { %v396_v8 = vsel %vm72_vm1, 1, %v2152_v4  ;;  %1957 = vmatpush3.bf16.msra.mxu0 %v1954_v3  ;;  %v1984_v17 = vld [vmem:[#allocation6 + $0x30] sm:$0xff]   ;;  %v1985_v18 = vld [vmem:[#allocation6 + $0x38] sm:$0xff]   ;;  %1756 = vmatprep.mubr.msk.bf16.mxu1 %vm2154_vm3, %v2153_v7  ;;  %v1994_v19 = vld [vmem:[#allocation6 + $0xc0] sm:$0xff]   ;;  %s2155_s22 = smov [#allocation9]  }
  0x3c   :  { %399 = vperm.xlu0 %1977, %v396_v8   ;;  %1760 = vmatprep.subr.bf16.mxu0 %v2153_v7  ;;  %v1995_v20 = vld [vmem:[#allocation6 + $0xc8] sm:$0xff]   ;;  %v1996_v21 = vld [vmem:[#allocation6 + $0xd0] sm:$0xff]   ;;  %v1997_v22 = vld [vmem:[#allocation6 + $0xd8] sm:$0xff]   ;;  %v391_v43 = vadd.f32 %v390_v40, %v389_v33  ;;  %s1527_s23 = sshll.u32 %s2155_s22, 4  ;;  %s1528_s23 = int_to_ptr.vmem [resolvable:$true] %s1527_s23 }
  0x3d   :  { %1743 = vmatpush3.bf16.msra.mxu1 %v1979_v12  ;;  %v1998_v23 = vld [vmem:[#allocation6 + $0xe0] sm:$0xff]   ;;  %v1999_v24 = vld [vmem:[#allocation6 + $0xe8] sm:$0xff]   ;;  %v1988_v45 = vld [vmem:[#allocation6 + $0x190] sm:$0xff]   ;;  %p2120_p8 = scmp.lt.s32.totalorder %s1528_s23, %s1528_s23 }
  0x3e   :  { %1738 = vmatmul.mubr.msk.f32.vlgmr.msra.gmra.mrb[0].mxu0 %vm81_vm0, %v2244_v10  ;;  %1744 = vmatprep.subr.bf16.mxu1 %v2153_v7  ;;  %s77_s1 = sadd.f32 1.0, %s76_s0  ;;  %v1986_v38 = vld [vmem:[#allocation6 + $0x180] sm:$0xff]   ;;  %v1987_v42 = vld [vmem:[#allocation6 + $0x188] sm:$0xff]   ;;  %v392_v46 = vrot.slane %v391_v43, 2  ;;  %v1989_v48 = vld [vmem:[#allocation6 + $0x198] sm:$0xff]  }
  0x3f   :  { %1776 = vmatprep.mubr.msk.bf16.mxu0 %vm2154_vm3, %v2153_v7  ;;  %1761 = vmatpush3.bf16.msra.mxu0 %v1994_v19  ;;  %v1990_v51 = vld [vmem:[#allocation6 + $0x1a0] sm:$0xff]   ;;  %v1991_v54 = vld [vmem:[#allocation6 + $0x1a8] sm:$0xff]   ;;  %v1992_v57 = vld [vmem:[#allocation6 + $0x1b0] sm:$0xff]   ;;  %s654_s16 = sadd.f32 1.0, %s1575_s15 }
  0x40   :  { %402 = vperm.xlu0 %1977, %v397_v11   ;;  %1762 = vmatprep.subr.bf16.mxu0 %v2153_v7  ;;  %v78_v27 = vstv %s77_s1  ;;  %v393_v49 = vadd.f32 %v392_v46, %v391_v43  ;;  %v1993_v59 = vld [vmem:[#allocation6 + $0x1b8] sm:$0xff]   ;;  %v2000_v62 = vld [vmem:[#allocation6 + $0xf0] sm:$0xff]   ;;  %v2014_v40 = vld [vmem:[#allocation6 + $0x60] sm:$0xff]   ;;  %s1215_s20 = sadd.f32 1.0, %s1611_s19 }
  0x41   :  { %1745 = vmatpush3.bf16.msra.mxu1 %v1980_v13  ;;  %v80_v28 = vmul.f32 %v78_v27, %v2229_v1  ;;  %v79_v29 = vmul.f32 %v78_v27, %v2224_v0  ;;  %v2001_v63 = vld [vmem:[#allocation6 + $0xf8] sm:$0xff]   ;;  %v2305_v4 = vld [vmem:[%s2452_s4] sm:$0xf] }
  0x42   :  { %1746 = vmatprep.subr.bf16.mxu1 %v2153_v7  ;;  %v394_v52 = vrot.slane %v393_v49, 1  ;;  %v2004_v19 = vld [vmem:[#allocation6 + $0x210] sm:$0xff]  }
  0x43   :  { %1763 = vmatpush3.bf16.msra.mxu0 %v1995_v20  ;;  %v2005_v20 = vld [vmem:[#allocation6 + $0x218] sm:$0xff]   ;;  %v2008_v27 = vld [vmem:[#allocation6 + $0x230] sm:$0xff]  }
  0x44   :  { %1764 = vmatprep.subr.bf16.mxu0 %v2153_v7  ;;  %v395_v56 = vadd.f32 %v394_v52, %v393_v49 }
  0x45   :  { %1747 = vmatpush3.bf16.msra.mxu1 %v1981_v14 }
  0x46   :  { %1748 = vmatprep.subr.bf16.mxu1 %v2153_v7 }
  0x47   :  { %1765 = vmatpush3.bf16.msra.mxu0 %v1996_v21  ;;  %v2006_v21 = vld [vmem:[#allocation6 + $0x220] sm:$0xff]  }
  0x48   :  { %1766 = vmatprep.subr.bf16.mxu0 %v2153_v7 }
  0x49   :  { %1749 = vmatpush3.bf16.msra.mxu1 %v1982_v15 }
  0x4a   :  { %1750 = vmatprep.subr.bf16.mxu1 %v2153_v7 }
  0x4b   :  { %1767 = vmatpush3.bf16.msra.mxu0 %v1997_v22 }
  0x4c   :  { %1768 = vmatprep.subr.bf16.mxu0 %v2153_v7 }
  0x4d   :  { %1751 = vmatpush3.bf16.msra.mxu1 %v1983_v16  ;;  %v2002_v16 = vld [vmem:[#allocation6 + $0x200] sm:$0xff]  }
  0x4e   :  { %1752 = vmatprep.subr.bf16.mxu1 %v2153_v7 }
  0x4f   :  { %1769 = vmatpush3.bf16.msra.mxu0 %v1998_v23  ;;  %v2007_v23 = vld [vmem:[#allocation6 + $0x228] sm:$0xff]  }
  0x50   :  { %1770 = vmatprep.subr.bf16.mxu0 %v2153_v7 }
  0x51   :  { %1753 = vmatpush3.bf16.msra.mxu1 %v1984_v17 }
  0x52   :  { %1754 = vmatprep.subr.bf16.mxu1 %v2153_v7 }
  0x53   :  { %1771 = vmatpush3.bf16.msra.mxu0 %v1999_v24 }
  0x54   :  { %1772 = vmatprep.subr.bf16.mxu0 %v2153_v7 }
  0x55   :  { %1755 = vmatpush3.bf16.msra.mxu1 %v1985_v18  ;;  %v2003_v18 = vld [vmem:[#allocation6 + $0x208] sm:$0xff]  }
  0x56   :  { %1780 = vmatprep.subr.bf16.mxu1 %v2153_v7 }
  0x57   :  { %1773 = vmatpush3.bf16.msra.mxu0 %v2000_v62 }
  0x58   :  { %1774 = vmatprep.subr.bf16.mxu0 %v2153_v7 }
  0x5b   :  { %1775 = vmatpush3.bf16.msra.mxu0 %v2001_v63 }
  0x5c   :  { %1800 = vmatprep.subr.bf16.mxu0 %v2153_v7 }
  0xbb   :  { %v2267_v25 = vpop.permute.xlu0 %399 }
  0xbc   :  { %vm404_vm4 = vcmp.eq.s32.totalorder %v2267_v25, 1  ;;  %v2050_v25 = vld [vmem:[#allocation6 + $0x140] sm:$0xff]  }
  0xbd   :  { %v406_v30 = vsel %vm404_vm4, %v2224_v0, 0.0  ;;  %v181_v0 = vlaneseq }
  0xbf   :  { %v2269_v26 = vpop.permute.xlu0 %402 }
  0xc0   :  { %vm405_vm5 = vcmp.eq.s32.totalorder %v2269_v26, 1  ;;  %v2052_v26 = vld [vmem:[#allocation6 + $0x150] sm:$0xff]  }
  0xc1   :  { %v407_v31 = vsel %vm405_vm5, %v2229_v1, 0.0  ;;  %v2297_v1 = vshrl.u32 %v181_v0, 7 }
  0xc2   :  { %v408_v36 = vadd.f32 %v407_v31, %v406_v30 }
  0xc3   :  { %v2300_v3 = vsub.s32 0, %v2297_v1  ;;  %v439_v22 = vsub.s32 2, %v2297_v1 }
  0xc4   :  { %v409_v41 = vrot.slane %v408_v36, 4 }
  0xc5   :  { %v184_v5 = vrot.slane %v2305_v4, %v2300_v3  ;;  %v440_v24 = vrot.slane %v2305_v4, %v439_v22 }
  0xc6   :  { %v410_v44 = vadd.f32 %v409_v41, %v408_v36  ;;  %v2010_v36 = vld [vmem:[#allocation6 + $0x40] sm:$0xff]   ;;  %v2015_v41 = vld [vmem:[#allocation6 + $0x68] sm:$0xff]  }
  0xc8   :  { %v411_v47 = vrot.slane %v410_v44, 2 }
  0xca   :  { %v412_v50 = vadd.f32 %v411_v47, %v410_v44  ;;  %v550_v47 = vsub.s32 3, %v2297_v1 }
  0xcc   :  { %v413_v53 = vrot.slane %v412_v50, 1  ;;  %v551_v49 = vrot.slane %v2305_v4, %v550_v47 }
  0xce   :  { %v414_v55 = vadd.f32 %v413_v53, %v412_v50 }
  0xd0   :  { %v415_v58 = vsub.f32 %v395_v56, %v414_v55 }
  0xd2   :  { %v417_v60 = vsel %vm416_vm6, %v414_v55, %v415_v58 }
  0xd3   :  { %v419_v61 = vpack.c.bf16 %v417_v60, %v417_v60 }
 0x111   :  { %v1739_v32 = vpop.f32.mrb[0].mxu0 }
 0x112   :  { %v160_v34 = vadd.f32 %v1739_v32, %v80_v28  ;;  %v154_v35 = vpop.f32.mrb[1].mxu0  ;;  %v2009_v32 = vld [vmem:[#allocation6 + $0x238] sm:$0xff]  }
 0x113   :  { %v155_v37 = vadd.f32 %v154_v35, %v79_v29 }
 0x115   :  { %v164_v39 = vpack.c.bf16 %v160_v34, %v155_v37  ;;  %v2011_v37 = vld [vmem:[#allocation6 + $0x48] sm:$0xff]  }
 0x117   :  { %1757 = vmatmul.mubr.bf16.vlgmr.msra.gmra.mrb[0].mxu1 %v164_v39  ;;  %v2013_v39 = vld [vmem:[#allocation6 + $0x58] sm:$0xff]  }
 0x118   :  { %1781 = vmatpush3.bf16.msra.mxu1 %v1986_v38  ;;  %1796 = vmatprep.mubr.msk.bf16.mxu1 %vm2154_vm3, %v2153_v7  ;;  %v2012_v38 = vld [vmem:[#allocation6 + $0x50] sm:$0xff]  }
 0x119   :  { %1782 = vmatprep.subr.bf16.mxu1 %v2153_v7 }
 0x11c   :  { %1783 = vmatpush3.bf16.msra.mxu1 %v1987_v42  ;;  %v2016_v42 = vld [vmem:[#allocation6 + $0x70] sm:$0xff]  }
 0x11d   :  { %1784 = vmatprep.subr.bf16.mxu1 %v2153_v7 }
 0x120   :  { %1785 = vmatpush3.bf16.msra.mxu1 %v1988_v45 }
 0x121   :  { %1786 = vmatprep.subr.bf16.mxu1 %v2153_v7 }
 0x124   :  { %1787 = vmatpush3.bf16.msra.mxu1 %v1989_v48  ;;  %v2334_v48 = vsub.s32 1, %v2297_v1 }
 0x125   :  { %1788 = vmatprep.subr.bf16.mxu1 %v2153_v7 }
 0x126   :  { %v297_v50 = vrot.slane %v2305_v4, %v2334_v48 }
 0x128   :  { %1789 = vmatpush3.bf16.msra.mxu1 %v1990_v51 }
 0x129   :  { %1790 = vmatprep.subr.bf16.mxu1 %v2153_v7 }
 0x12c   :  { %1791 = vmatpush3.bf16.msra.mxu1 %v1991_v54 }
 0x12d   :  { %1792 = vmatprep.subr.bf16.mxu1 %v2153_v7 }
 0x130   :  { %1793 = vmatpush3.bf16.msra.mxu1 %v1992_v57 }
 0x131   :  { %1794 = vmatprep.subr.bf16.mxu1 %v2153_v7 }
 0x134   :  { %1795 = vmatpush3.bf16.msra.mxu1 %v1993_v59 }
 0x137   :  { %1797 = vmatmul.mubr.bf16.vlgmr.msra.gmra.mrb[4].mxu1 %v419_v61 }
 0x138   :  { %1824 = vmatprep.mubr.msk.f32.mxu1 %vm81_vm0, %v2231_v2 }
 0x1ea   :  { %v267_v6 = vpop.f32.mrb[0].mxu1 }
 0x1eb   :  { %v268_v8 = vadd.f32 %v267_v6, %v184_v5  ;;  %v1758_v9 = vpop.f32.mrb[1].mxu1 }
 0x1ec   :  { %v270_v11 = vpop.f32.mrb[2].mxu1 }
 0x1ed   :  { %v271_v12 = vadd.f32 %v270_v11, %v184_v5  ;;  %v1759_v13 = vpop.f32.mrb[3].mxu1  ;;  %v274_v14 = vmax.f32 %v268_v8, 0.0 }
 0x1ef   :  { %v275_v15 = vmax.f32 %v271_v12, 0.0 }
 0x1f1   :  { %v276_v17 = vpack.c.bf16 %v275_v15, %v274_v14 }
 0x1f3   :  { %1777 = vmatmul.mubr.bf16.vlgmr.msra.gmra.mrb[4].mxu0 %v276_v17 }
 0x1f4   :  { %1801 = vmatpush3.bf16.msra.mxu0 %v2002_v16  ;;  %1816 = vmatprep.mubr.msk.bf16.mxu0 %vm2154_vm3, %v2153_v7 }
 0x1f5   :  { %1802 = vmatprep.subr.bf16.mxu0 %v2153_v7 }
 0x1f8   :  { %1803 = vmatpush3.bf16.msra.mxu0 %v2003_v18 }
 0x1f9   :  { %1804 = vmatprep.subr.bf16.mxu0 %v2153_v7 }
 0x1fc   :  { %1805 = vmatpush3.bf16.msra.mxu0 %v2004_v19 }
 0x1fd   :  { %1806 = vmatprep.subr.bf16.mxu0 %v2153_v7 }
 0x200   :  { %1807 = vmatpush3.bf16.msra.mxu0 %v2005_v20 }
 0x201   :  { %1808 = vmatprep.subr.bf16.mxu0 %v2153_v7 }
 0x204   :  { %1809 = vmatpush3.bf16.msra.mxu0 %v2006_v21 }
 0x205   :  { %1810 = vmatprep.subr.bf16.mxu0 %v2153_v7 }
 0x208   :  { %1811 = vmatpush3.bf16.msra.mxu0 %v2007_v23 }
 0x209   :  { %1812 = vmatprep.subr.bf16.mxu0 %v2153_v7 }
 0x20a   :  { %v523_v28 = vpop.f32.mrb[4].mxu1 }
 0x20b   :  { %v524_v29 = vadd.f32 %v523_v28, %v440_v24  ;;  %v1798_v30 = vpop.f32.mrb[5].mxu1 }
 0x20c   :  { %v526_v31 = vpop.f32.mrb[6].mxu1  ;;  %1813 = vmatpush3.bf16.msra.mxu0 %v2008_v27 }
 0x20d   :  { %v529_v33 = vmax.f32 %v524_v29, 0.0  ;;  %v1799_v34 = vpop.f32.mrb[7].mxu1  ;;  %1814 = vmatprep.subr.bf16.mxu0 %v2153_v7  ;;  %v2017_v31 = vld [vmem:[#allocation6 + $0x78] sm:$0xff]  }
 0x20e   :  { %v2029_v34 = vld [vmem:[#allocation6 + $0x118] sm:$0xff]  }
 0x20f   :  { %v530_v35 = vpack.c.bf16 %v529_v33, %v529_v33  ;;  %v2028_v33 = vld [vmem:[#allocation6 + $0x110] sm:$0xff]  }
 0x210   :  { %1815 = vmatpush3.bf16.msra.mxu0 %v2009_v32  ;;  %v2026_v32 = vld [vmem:[#allocation6 + $0x100] sm:$0xff]  }
 0x211   :  { %1827 = vmatprep.subr.bf16.mxu0 %v2153_v7 }
 0x213   :  { %1817 = vmatmul.mubr.bf16.vlgmr.msra.gmra.mrb[8].mxu0 %v530_v35  ;;  %v2030_v35 = vld [vmem:[#allocation6 + $0x120] sm:$0xff]  }
 0x214   :  { %1843 = vmatprep.mubr.msk.bf16.mxu0 %vm2154_vm3, %v2153_v7  ;;  %1828 = vmatpush3.bf16.msra.mxu0 %v2010_v36  ;;  %v2031_v36 = vld [vmem:[#allocation6 + $0x128] sm:$0xff]  }
 0x215   :  { %1829 = vmatprep.subr.bf16.mxu0 %v2153_v7 }
 0x218   :  { %1830 = vmatpush3.bf16.msra.mxu0 %v2011_v37  ;;  %v655_v37 = vstv %s654_s16 }
 0x219   :  { %1831 = vmatprep.subr.bf16.mxu0 %v2153_v7 }
 0x21c   :  { %1832 = vmatpush3.bf16.msra.mxu0 %v2012_v38 }
 0x21d   :  { %1833 = vmatprep.subr.bf16.mxu0 %v2153_v7 }
 0x220   :  { %1834 = vmatpush3.bf16.msra.mxu0 %v2013_v39 }
 0x221   :  { %1835 = vmatprep.subr.bf16.mxu0 %v2153_v7 }
 0x224   :  { %1836 = vmatpush3.bf16.msra.mxu0 %v2014_v40 }
 0x225   :  { %1837 = vmatprep.subr.bf16.mxu0 %v2153_v7 }
 0x228   :  { %1838 = vmatpush3.bf16.msra.mxu0 %v2015_v41 }
 0x229   :  { %1839 = vmatprep.subr.bf16.mxu0 %v2153_v7 }
 0x22c   :  { %1840 = vmatpush3.bf16.msra.mxu0 %v2016_v42 }
 0x22d   :  { %1841 = vmatprep.subr.bf16.mxu0 %v2153_v7 }
 0x230   :  { %1842 = vmatpush3.bf16.msra.mxu0 %v2017_v31  ;;  %v2046_v31 = vld [vmem:[#allocation6 + $0xa0] sm:$0xff]  }
 0x231   :  { %1867 = vmatprep.subr.bf16.mxu0 %v2153_v7 }
 0x2c6   :  { %v380_v43 = vpop.f32.mrb[4].mxu0 }
 0x2c7   :  { %v1778_v44 = vpop.f32.mrb[5].mxu0  ;;  %v381_v54 = vadd.f32 %v380_v43, %v297_v50 }
 0x2c8   :  { %v383_v45 = vpop.f32.mrb[6].mxu0  ;;  %v2018_v44 = vld [vmem:[#allocation6 + $0x1c0] sm:$0xff]  }
 0x2c9   :  { %v1779_v46 = vpop.f32.mrb[7].mxu0  ;;  %v384_v55 = vadd.f32 %v383_v45, %v297_v50  ;;  %v387_v61 = vmax.f32 %v381_v54, 0.0  ;;  %v2021_v50 = vld [vmem:[#allocation6 + $0x1d8] sm:$0xff]  }
 0x2ca   :  { %v2019_v46 = vld [vmem:[#allocation6 + $0x1c8] sm:$0xff]   ;;  %v2025_v54 = vld [vmem:[#allocation6 + $0x1f8] sm:$0xff]  }
 0x2cb   :  { %v388_v62 = vmax.f32 %v384_v55, 0.0 }
 0x2e6   :  { %v634_v51 = vpop.f32.mrb[8].mxu0 }
 0x2e7   :  { %v635_v52 = vadd.f32 %v634_v51, %v551_v49  ;;  %v1818_v53 = vpop.f32.mrb[9].mxu0  ;;  %v2020_v49 = vld [vmem:[#allocation6 + $0x1d0] sm:$0xff]   ;;  %v2022_v51 = vld [vmem:[#allocation6 + $0x1e0] sm:$0xff]  }
 0x2e8   :  { %v637_v56 = vpop.f32.mrb[10].mxu0  ;;  %v2024_v53 = vld [vmem:[#allocation6 + $0x1f0] sm:$0xff]  }
 0x2e9   :  { %v640_v57 = vmax.f32 %v635_v52, 0.0  ;;  %v1819_v58 = vpop.f32.mrb[11].mxu0  ;;  %v2023_v52 = vld [vmem:[#allocation6 + $0x1e8] sm:$0xff]   ;;  %v2032_v56 = vld [vmem:[#allocation6 + $0x130] sm:$0xff]  }
 0x2ea   :  { %v2380_v58 = vld [vmem:[%s2452_s4 + $0x4] sm:$0xf] }
 0x2eb   :  { %v644_v59 = vrot.slane %v640_v57, %v2300_v3  ;;  %v648_v60 = vrot.slane %v640_v57, %v2334_v48 }
 0x2ed   :  { %v649_v63 = vsel %vm404_vm4, %v644_v59, %v648_v60  ;;  %v650_v0 = vsel %vm405_vm5, %v644_v59, %v648_v60  ;;  %v756_v59 = vrot.slane %v2380_v58, %v2300_v3 }
 0x2ee   :  { %v651_v4 = vadd.f32 %v649_v63, %v387_v61  ;;  %v652_v5 = vadd.f32 %v650_v0, %v388_v62 }
 0x2f0   :  { %v961_v6 = vadd.f32 %v652_v5, %v651_v4  ;;  %v968_v8 = vsel %vm404_vm4, %v651_v4, 0.0  ;;  %v969_v9 = vsel %vm405_vm5, %v652_v5, 0.0  ;;  %v1958_v11 = vpack.c.bf16 %v652_v5, %v651_v4 }
 0x2f1   :  { %v970_v12 = vadd.f32 %v969_v9, %v968_v8  ;;  %v657_v38 = vmul.f32 %v655_v37, %v652_v5  ;;  %v656_v40 = vmul.f32 %v655_v37, %v651_v4  ;;  %v2035_v9 = vld [vmem:[#allocation6 + $0x248] sm:$0xff]   ;;  %v1112_v37 = vrot.slane %v2380_v58, %v550_v47 }
 0x2f2   :  { %v962_v13 = vrot.slane %v961_v6, 4  ;;  %1959 = vmatprep.subr.bf16.mxu1 %v1958_v11 }
 0x2f3   :  { %v971_v14 = vrot.slane %v970_v12, 4  ;;  %1961 = vmatpush3.bf16.msra.mxu1 %v1958_v11  ;;  %v2036_v11 = vld [vmem:[#allocation6 + $0x250] sm:$0xff]  }
 0x2f4   :  { %v963_v15 = vadd.f32 %v962_v13, %v961_v6  ;;  %1847 = vmatprep.subr.bf16.mxu1 %v2153_v7  ;;  %v2034_v6 = vld [vmem:[#allocation6 + $0x240] sm:$0xff]  }
 0x2f5   :  { %v972_v16 = vadd.f32 %v971_v14, %v970_v12  ;;  %v2037_v12 = vld [vmem:[#allocation6 + $0x258] sm:$0xff]   ;;  %v2038_v13 = vld [vmem:[#allocation6 + $0x260] sm:$0xff]   ;;  %v2039_v14 = vld [vmem:[#allocation6 + $0x268] sm:$0xff]  }
 0x2f6   :  { %v964_v17 = vrot.slane %v963_v15, 2  ;;  %1825 = vmatmul.mubr.msk.f32.vlgmr.msra.gmra.mrb[8].mxu1 %vm81_vm0, %v2244_v10  ;;  %v2027_v10 = vld [vmem:[#allocation6 + $0x108] sm:$0xff]  }
 0x2f7   :  { %v973_v18 = vrot.slane %v972_v16, 2  ;;  %1863 = vmatprep.mubr.msk.bf16.mxu1 %vm2154_vm3, %v2153_v7  ;;  %1848 = vmatpush3.bf16.msra.mxu1 %v2026_v32  ;;  %v2047_v32 = vld [vmem:[#allocation6 + $0xa8] sm:$0xff]  }
 0x2f8   :  { %v965_v19 = vadd.f32 %v964_v17, %v963_v15  ;;  %1849 = vmatprep.subr.bf16.mxu1 %v2153_v7  ;;  %v1001_v15 = vrot.slane %v2380_v58, %v439_v22  ;;  %v2042_v22 = vld [vmem:[#allocation6 + $0x80] sm:$0xff]  }
 0x2f9   :  { %v974_v20 = vadd.f32 %v973_v18, %v972_v16  ;;  %v2040_v16 = vld [vmem:[#allocation6 + $0x270] sm:$0xff]  }
 0x2fa   :  { %v966_v21 = vrot.slane %v965_v19, 1 }
 0x2fb   :  { %v975_v23 = vrot.slane %v974_v20, 1  ;;  %1850 = vmatpush3.bf16.msra.mxu1 %v2027_v10  ;;  %v2048_v10 = vld [vmem:[#allocation6 + $0xb0] sm:$0xff]  }
 0x2fc   :  { %v967_v24 = vadd.f32 %v966_v21, %v965_v19  ;;  %1851 = vmatprep.subr.bf16.mxu1 %v2153_v7  ;;  %v2041_v21 = vld [vmem:[#allocation6 + $0x278] sm:$0xff]  }
 0x2fd   :  { %v976_v27 = vadd.f32 %v975_v23, %v974_v20 }
 0x2ff   :  { %v977_v28 = vsub.f32 %v967_v24, %v976_v27  ;;  %1852 = vmatpush3.bf16.msra.mxu1 %v2028_v33 }
 0x300   :  { %1853 = vmatprep.subr.bf16.mxu1 %v2153_v7 }
 0x301   :  { %v978_v29 = vsel %vm416_vm6, %v976_v27, %v977_v28  ;;  %v2043_v28 = vld [vmem:[#allocation6 + $0x88] sm:$0xff]  }
 0x302   :  { %v979_v30 = vadd.f32 %v978_v29, %v640_v57  ;;  %v2033_v57 = vld [vmem:[#allocation6 + $0x138] sm:$0xff]   ;;  %v2044_v29 = vld [vmem:[#allocation6 + $0x90] sm:$0xff]  }
 0x303   :  { %1854 = vmatpush3.bf16.msra.mxu1 %v2029_v34 }
 0x304   :  { %1855 = vmatprep.subr.bf16.mxu1 %v2153_v7  ;;  %v980_v55 = vpack.c.bf16 %v979_v30, %v979_v30  ;;  %v2045_v30 = vld [vmem:[#allocation6 + $0x98] sm:$0xff]  }
 0x307   :  { %1856 = vmatpush3.bf16.msra.mxu1 %v2030_v35 }
 0x308   :  { %1857 = vmatprep.subr.bf16.mxu1 %v2153_v7 }
 0x30b   :  { %1858 = vmatpush3.bf16.msra.mxu1 %v2031_v36 }
 0x30c   :  { %1859 = vmatprep.subr.bf16.mxu1 %v2153_v7 }
 0x30f   :  { %1860 = vmatpush3.bf16.msra.mxu1 %v2032_v56  ;;  %v2058_v56 = vld [vmem:[#allocation2 + $0x8] sm:$0xff] }
 0x310   :  { %1861 = vmatprep.subr.bf16.mxu1 %v2153_v7 }
 0x313   :  { %1862 = vmatpush3.bf16.msra.mxu1 %v2033_v57  ;;  %v2049_v57 = vld [vmem:[#allocation6 + $0xb8] sm:$0xff]  }
 0x314   :  { %1887 = vmatprep.subr.bf16.mxu1 %v2153_v7 }
 0x3c9   :  { %v1826_v39 = vpop.f32.mrb[8].mxu1 }
 0x3ca   :  { %v730_v41 = vadd.f32 %v1826_v39, %v657_v38  ;;  %v724_v42 = vpop.f32.mrb[9].mxu1  ;;  %v869_v38 = vrot.slane %v2380_v58, %v2334_v48  ;;  %v2051_v58 = vld [vmem:[#allocation6 + $0x148] sm:$0xff]  }
 0x3cb   :  { %v725_v43 = vadd.f32 %v724_v42, %v656_v40 }
 0x3cd   :  { %v735_v45 = vpack.c.bf16 %v730_v41, %v725_v43 }
 0x3cf   :  { %1844 = vmatmul.mubr.bf16.vlgmr.msra.gmra.mrb[12].mxu0 %v735_v45 }
 0x3d0   :  { %1868 = vmatpush3.bf16.msra.mxu0 %v2018_v44  ;;  %1883 = vmatprep.mubr.msk.bf16.mxu0 %vm2154_vm3, %v2153_v7 }
 0x3d1   :  { %1869 = vmatprep.subr.bf16.mxu0 %v2153_v7 }
 0x3d4   :  { %1870 = vmatpush3.bf16.msra.mxu0 %v2019_v46 }
 0x3d5   :  { %1871 = vmatprep.subr.bf16.mxu0 %v2153_v7 }
 0x3d8   :  { %1872 = vmatpush3.bf16.msra.mxu0 %v2020_v49 }
 0x3d9   :  { %1873 = vmatprep.subr.bf16.mxu0 %v2153_v7 }
 0x3dc   :  { %1874 = vmatpush3.bf16.msra.mxu0 %v2021_v50 }
 0x3dd   :  { %1875 = vmatprep.subr.bf16.mxu0 %v2153_v7 }
 0x3e0   :  { %1876 = vmatpush3.bf16.msra.mxu0 %v2022_v51 }
 0x3e1   :  { %1877 = vmatprep.subr.bf16.mxu0 %v2153_v7 }
 0x3e4   :  { %1878 = vmatpush3.bf16.msra.mxu0 %v2023_v52 }
 0x3e5   :  { %1879 = vmatprep.subr.bf16.mxu0 %v2153_v7 }
 0x3e8   :  { %1880 = vmatpush3.bf16.msra.mxu0 %v2024_v53 }
 0x3e9   :  { %1881 = vmatprep.subr.bf16.mxu0 %v2153_v7 }
 0x3ec   :  { %1882 = vmatpush3.bf16.msra.mxu0 %v2025_v54 }
 0x3ef   :  { %1884 = vmatmul.mubr.bf16.vlgmr.msra.gmra.mrb[16].mxu0 %v980_v55 }
 0x3f0   :  { %1911 = vmatprep.mubr.msk.f32.mxu0 %vm81_vm0, %v2231_v2 }
 0x4a2   :  { %v839_v60 = vpop.f32.mrb[12].mxu0 }
 0x4a3   :  { %v840_v61 = vadd.f32 %v839_v60, %v756_v59  ;;  %v1845_v62 = vpop.f32.mrb[13].mxu0  ;;  %v2054_v60 = vld [vmem:[#allocation6 + $0x160] sm:$0xff]  }
 0x4a4   :  { %v842_v2 = vpop.f32.mrb[14].mxu0  ;;  %v1216_v62 = vstv %s1215_s20 }
 0x4a5   :  { %v843_v63 = vadd.f32 %v842_v2, %v756_v59  ;;  %v1846_v0 = vpop.f32.mrb[15].mxu0  ;;  %v846_v4 = vmax.f32 %v840_v61, 0.0  ;;  %v2053_v59 = vld [vmem:[#allocation6 + $0x158] sm:$0xff]   ;;  %v2055_v61 = vld [vmem:[#allocation6 + $0x168] sm:$0xff]  }
 0x4a7   :  { %v847_v5 = vmax.f32 %v843_v63, 0.0 }
 0x4a9   :  { %v848_v8 = vpack.c.bf16 %v847_v5, %v846_v4 }
 0x4ab   :  { %1864 = vmatmul.mubr.bf16.vlgmr.msra.gmra.mrb[12].mxu1 %v848_v8 }
 0x4ac   :  { %1888 = vmatpush3.bf16.msra.mxu1 %v2034_v6  ;;  %1903 = vmatprep.mubr.msk.bf16.mxu1 %vm2154_vm3, %v2153_v7 }
 0x4ad   :  { %1889 = vmatprep.subr.bf16.mxu1 %v2153_v7 }
 0x4b0   :  { %1890 = vmatpush3.bf16.msra.mxu1 %v2035_v9  ;;  %v2056_v9 = vld [vmem:[#allocation6 + $0x170] sm:$0xff]  }
 0x4b1   :  { %1891 = vmatprep.subr.bf16.mxu1 %v2153_v7 }
 0x4b4   :  { %1892 = vmatpush3.bf16.msra.mxu1 %v2036_v11  ;;  %v2057_v11 = vld [vmem:[#allocation6 + $0x178] sm:$0xff]  }
 0x4b5   :  { %1893 = vmatprep.subr.bf16.mxu1 %v2153_v7 }
 0x4b8   :  { %1894 = vmatpush3.bf16.msra.mxu1 %v2037_v12  ;;  %v1614_v12 = vld [vmem:[%s2452_s4 + $0x8] sm:$0xf]  ;;  %s2115_s4 = scalar_lea.vmem %s1528_s23, 256 }
 0x4b9   :  { %1895 = vmatprep.subr.bf16.mxu1 %v2153_v7  ;;  %p2116_p7 = scmp.ne.s32.totalorder %s1528_s23, %s2115_s4  ;;  %p2121_p9 = scmp.lt.s32.totalorder %s2115_s4, %s2115_s4 }
 0x4bb   :  { %p2122_p10 = por %p2121_p9, %p2120_p8 }
 0x4bc   :  { %1896 = vmatpush3.bf16.msra.mxu1 %v2038_v13  ;;  %v1317_v13 = vrot.slane %v1614_v12, %v2300_v3 }
 0x4bd   :  { %1897 = vmatprep.subr.bf16.mxu1 %v2153_v7  ;;  %p2123_p11 = pnand %p2122_p10, %p2116_p7 }
 0x4c0   :  { %1898 = vmatpush3.bf16.msra.mxu1 %v2039_v14 }
 0x4c1   :  { %1899 = vmatprep.subr.bf16.mxu1 %v2153_v7 }
 0x4c2   :  { %v1084_v17 = vpop.f32.mrb[16].mxu0 }
 0x4c3   :  { %v1085_v18 = vadd.f32 %v1084_v17, %v1001_v15  ;;  %v1885_v19 = vpop.f32.mrb[17].mxu0 }
 0x4c4   :  { %v1087_v20 = vpop.f32.mrb[18].mxu0  ;;  %1900 = vmatpush3.bf16.msra.mxu1 %v2040_v16 }
 0x4c5   :  { %v1090_v23 = vmax.f32 %v1085_v18, 0.0  ;;  %v1886_v24 = vpop.f32.mrb[19].mxu0  ;;  %1901 = vmatprep.subr.bf16.mxu1 %v2153_v7 }
 0x4c7   :  { %v1091_v27 = vpack.c.bf16 %v1090_v23, %v1090_v23 }
 0x4c8   :  { %1902 = vmatpush3.bf16.msra.mxu1 %v2041_v21 }
 0x4c9   :  { %1914 = vmatprep.subr.bf16.mxu1 %v2153_v7 }
 0x4cb   :  { %1904 = vmatmul.mubr.bf16.vlgmr.msra.gmra.mrb[16].mxu1 %v1091_v27 }
 0x4cc   :  { %1930 = vmatprep.mubr.msk.bf16.mxu1 %vm2154_vm3, %v2153_v7  ;;  %1915 = vmatpush3.bf16.msra.mxu1 %v2042_v22 }
 0x4cd   :  { %1916 = vmatprep.subr.bf16.mxu1 %v2153_v7 }
 0x4d0   :  { %1917 = vmatpush3.bf16.msra.mxu1 %v2043_v28 }
 0x4d1   :  { %1918 = vmatprep.subr.bf16.mxu1 %v2153_v7 }
 0x4d4   :  { %1919 = vmatpush3.bf16.msra.mxu1 %v2044_v29 }
 0x4d5   :  { %1920 = vmatprep.subr.bf16.mxu1 %v2153_v7 }
 0x4d8   :  { %1921 = vmatpush3.bf16.msra.mxu1 %v2045_v30 }
 0x4d9   :  { %1922 = vmatprep.subr.bf16.mxu1 %v2153_v7 }
 0x4dc   :  { %1923 = vmatpush3.bf16.msra.mxu1 %v2046_v31 }
 0x4dd   :  { %1924 = vmatprep.subr.bf16.mxu1 %v2153_v7 }
 0x4e0   :  { %1925 = vmatpush3.bf16.msra.mxu1 %v2047_v32 }
 0x4e1   :  { %1926 = vmatprep.subr.bf16.mxu1 %v2153_v7 }
 0x4e4   :  { %1927 = vmatpush3.bf16.msra.mxu1 %v2048_v10 }
 0x4e5   :  { %1928 = vmatprep.subr.bf16.mxu1 %v2153_v7 }
 0x4e8   :  { %1929 = vmatpush3.bf16.msra.mxu1 %v2049_v57 }
 0x57e   :  { %v952_v33 = vpop.f32.mrb[12].mxu1 }
 0x57f   :  { %v1865_v34 = vpop.f32.mrb[13].mxu1  ;;  %v953_v42 = vadd.f32 %v952_v33, %v869_v38 }
 0x580   :  { %v955_v35 = vpop.f32.mrb[14].mxu1 }
 0x581   :  { %v1866_v36 = vpop.f32.mrb[15].mxu1  ;;  %v956_v43 = vadd.f32 %v955_v35, %v869_v38  ;;  %v959_v51 = vmax.f32 %v953_v42, 0.0 }
 0x583   :  { %v960_v52 = vmax.f32 %v956_v43, 0.0 }
 0x59e   :  { %v1195_v39 = vpop.f32.mrb[16].mxu1 }
 0x59f   :  { %v1196_v40 = vadd.f32 %v1195_v39, %v1112_v37  ;;  %v1905_v41 = vpop.f32.mrb[17].mxu1 }
 0x5a0   :  { %v1198_v44 = vpop.f32.mrb[18].mxu1 }
 0x5a1   :  { %v1201_v45 = vmax.f32 %v1196_v40, 0.0  ;;  %v1906_v46 = vpop.f32.mrb[19].mxu1 }
 0x5a3   :  { %v1205_v49 = vrot.slane %v1201_v45, %v2300_v3  ;;  %v1209_v50 = vrot.slane %v1201_v45, %v2334_v48 }
 0x5a5   :  { %v1210_v1 = vsel %vm404_vm4, %v1205_v49, %v1209_v50  ;;  %v1211_v47 = vsel %vm405_vm5, %v1205_v49, %v1209_v50 }
 0x5a6   :  { %v1212_v53 = vadd.f32 %v1210_v1, %v959_v51  ;;  %v1213_v54 = vadd.f32 %v1211_v47, %v960_v52 }
 0x5a8   :  { %v1962_v55 = vpack.c.bf16 %v1213_v54, %v1212_v53  ;;  %v1218_v2 = vmul.f32 %v1216_v62, %v1213_v54  ;;  %v1217_v0 = vmul.f32 %v1216_v62, %v1212_v53 }
 0x5aa   :  { %1963 = vmatprep.subr.bf16.mxu0 %v1962_v55 }
 0x5ab   :  { %1965 = vmatpush3.bf16.msra.mxu0 %v1962_v55 }
 0x5ac   :  { %1934 = vmatprep.subr.bf16.mxu0 %v2153_v7 }
 0x5ae   :  { %1912 = vmatmul.mubr.msk.f32.vlgmr.msra.gmra.mrb[2].mxu0 %vm81_vm0, %v2058_v56 }
 0x5af   :  { %1950 = vmatprep.mubr.msk.bf16.mxu0 %vm2154_vm3, %v2153_v7  ;;  %1935 = vmatpush3.bf16.msra.mxu0 %v2050_v25 }
 0x5b0   :  { %1936 = vmatprep.subr.bf16.mxu0 %v2153_v7 }
 0x5b3   :  { %1937 = vmatpush3.bf16.msra.mxu0 %v2051_v58 }
 0x5b4   :  { %1938 = vmatprep.subr.bf16.mxu0 %v2153_v7 }
 0x5b7   :  { %1939 = vmatpush3.bf16.msra.mxu0 %v2052_v26 }
 0x5b8   :  { %1940 = vmatprep.subr.bf16.mxu0 %v2153_v7 }
 0x5bb   :  { %1941 = vmatpush3.bf16.msra.mxu0 %v2053_v59 }
 0x5bc   :  { %1942 = vmatprep.subr.bf16.mxu0 %v2153_v7 }
 0x5bf   :  { %1943 = vmatpush3.bf16.msra.mxu0 %v2054_v60 }
 0x5c0   :  { %1944 = vmatprep.subr.bf16.mxu0 %v2153_v7 }
 0x5c3   :  { %1945 = vmatpush3.bf16.msra.mxu0 %v2055_v61 }
 0x5c4   :  { %1946 = vmatprep.subr.bf16.mxu0 %v2153_v7 }
 0x5c7   :  { %1947 = vmatpush3.bf16.msra.mxu0 %v2056_v9 }
 0x5c8   :  { %1948 = vmatprep.subr.bf16.mxu0 %v2153_v7  ;;  %v1430_v7 = vrot.slane %v1614_v12, %v2334_v48 }
 0x5cb   :  { %1949 = vmatpush3.bf16.msra.mxu0 %v2057_v11 }
 0x681   :  { %v1913_v63 = vpop.f32.mrb[2].mxu0 }
 0x682   :  { %v1291_v4 = vadd.f32 %v1913_v63, %v1218_v2  ;;  %v1285_v5 = vpop.f32.mrb[3].mxu0 }
 0x683   :  { %v1286_v6 = vadd.f32 %v1285_v5, %v1217_v0 }
 0x685   :  { %v1296_v8 = vpack.c.bf16 %v1291_v4, %v1286_v6 }
 0x687   :  { %1931 = vmatmul.mubr.bf16.vlgmr.msra.gmra.mrb[20].mxu1 %v1296_v8 }
 0x75a   :  { %v1400_v14 = vpop.f32.mrb[20].mxu1 }
 0x75b   :  { %v1401_v15 = vadd.f32 %v1400_v14, %v1317_v13  ;;  %v1932_v16 = vpop.f32.mrb[21].mxu1 }
 0x75c   :  { %v1403_v17 = vpop.f32.mrb[22].mxu1 }
 0x75d   :  { %v1404_v18 = vadd.f32 %v1403_v17, %v1317_v13  ;;  %v1933_v19 = vpop.f32.mrb[23].mxu1  ;;  %v1407_v20 = vmax.f32 %v1401_v15, 0.0 }
 0x75f   :  { %v1408_v21 = vmax.f32 %v1404_v18, 0.0 }
 0x761   :  { %v1409_v23 = vpack.c.bf16 %v1408_v21, %v1407_v20 }
 0x763   :  { %1951 = vmatmul.mubr.bf16.vlgmr.msra.gmra.mrb[20].mxu0 %v1409_v23 }
 0x836   :  { %v1513_v24 = vpop.f32.mrb[20].mxu0 }
 0x837   :  { %v1514_v27 = vadd.f32 %v1513_v24, %v1430_v7  ;;  %v1952_v22 = vpop.f32.mrb[21].mxu0 }
 0x838   :  { %v1516_v28 = vpop.f32.mrb[22].mxu0 }
 0x839   :  { %1520 = vst [vmem:[#allocation9] sm:$0xff] %v1514_v27  ;;  %v1517_v3 = vadd.f32 %v1516_v28, %v1430_v7  ;;  %v1953_v29 = vpop.f32.mrb[23].mxu0 }
 0x83b   :  { %1521 = vst [vmem:[#allocation9 + $0x8] sm:$0xff] %v1517_v3 }
 0x83c   :  { %2126 = shalt.err (!%p2123_p11)
}
 0x83d   :  { %s2127_s26 = scalar_lea.hbm %s2454_s6, 256 }
 0x83e   :  { %p2128_p12 = scmp.ne.s32.totalorder %s2454_s6, %s2127_s26  ;;  %p2131_p13 = scmp.lt.u32.totalorder %s2127_s26, %s2454_s6 }
 0x840   :  { %p2133_p0 = pnand %p2131_p13, %p2128_p12 }
 0x842   :  { %2136 = shalt.err (!%p2133_p0)
}
 0x843   :  { %1533 = dma.vmem_to_hbm [thread:$0]  %s1528_s23, 256, %s2454_s6, [#allocation4], %s2146_s7, %s2146_s7, %s2147_s8  }
 0x844   :  { %2143 = dma.done.wait [#allocation4], 256  }
 0x845   :  { %2144 = vsyncadd [#allocation4], 4294967040 }
 0x846   :  { %1537 = vsyncpa [#allocation3], 1 }
 0x847   :  { %1538 = vsyncpa [#allocation7], 1 }
 0x848   :  { %1539 = vsyncpa [#allocation4], 1 }
 0x849   :  { %1540 = vsyncpa [#allocation5], 1 }

</bundles_post_ra>
